<compile_context>
chip_gen: v7x
topology: tpu7x:2x2x1
jax: 0.10.0
libtpu: 0.0.40
codegen_flags: <defaults>
</compile_context>

<pallas_src>
import jax
import jax.numpy as jnp
from jax.experimental import pallas as pl
from jax.experimental.pallas import tpu as pltpu


def weighted_loss(pred, targ, weights, action_dim, online_weight=1.0,
                  max_tile_bytes=4 << 20):
    """Returns (weighted_loss, {'a0_loss': a0_loss}) matching the torch module."""
    B, H, T = pred.shape
    assert targ.shape == (B, H, T)
    assert weights.shape == (H, T)
    assert 0 < action_dim <= T, "a0 layout needs action_dim <= transition_dim"
    assert targ.dtype == pred.dtype
    L = H * T

    # a0 reduction window: smallest 128-aligned lane group covering action_dim.
    A0C = min(L, -(-action_dim // 128) * 128)

    in_itemsize = jnp.dtype(pred.dtype).itemsize

    # Lane-dense layout; inputs stay in native dtype (no extra HBM cast pass).
    pred2 = pred.reshape(B, L)
    targ2 = targ.reshape(B, L)
    w_flat = weights.reshape(1, L).astype(jnp.float32)

    # Masked reciprocal of weights[0, :action_dim] on the first lanes, 0 after
    # (division hoisted out of the streaming loop).
    lane = jnp.arange(A0C, dtype=jnp.int32)
    a0w = jnp.where(lane < action_dim, 1.0 / w_flat[0, :A0C], 0.0)
    a0w = a0w.reshape(1, A0C).astype(jnp.float32)

    # ---- batch-tile selection (explicit VMEM budget, works on v5e/v6e/v7x) ---
    VMEM_BUDGET = 48 << 20                      # < v7x 64 MiB physical VMEM
    row_in = L * in_itemsize                    # one batch row, native dtype
    row_f32 = L * 4
    per_row = 4 * row_in + 4 * row_f32          # 2 inputs x 2 buffers + f32 temps
    fixed = 4 * (row_f32 + A0C * 4) + 4 * 8 * 256 * 4 + (1 << 20)
    if fixed + 8 * per_row > VMEM_BUDGET:
        # TODO(synk): tile the lane axis with a second ("arbitrary") grid dim
        # and accumulate partials across it for very large horizon*transition.
        raise ValueError("horizon * transition_dim too large for a single lane tile")

    tb_rows_vmem = (VMEM_BUDGET - fixed) // per_row
    tb_rows_tile = max(1, max_tile_bytes // row_in)
    tb_cap = max(8, (min(tb_rows_vmem, tb_rows_tile) // 8) * 8)

    if B <= 8:
        TB = B                                   # full-dim block, no overrun
        num_tiles = 1
    else:
        b_ceil8 = -(-B // 8) * 8
        TB = min(tb_cap, b_ceil8)
        num_tiles = pl.cdiv(B, TB)
        if num_tiles == 1:
            # v7x has 2 TensorCores: make the parallel grid axis >= 2 steps.
            half = -(-B // 2)
            TB = max(8, -(-half // 8) * 8)
            num_tiles = pl.cdiv(B, TB)

    needs_mask = (TB * num_tiles) != B           # last block overruns the batch
    vmem_limit = int(min(VMEM_BUDGET, max(16 << 20, fixed + TB * per_row)))

    def kernel(pred_ref, targ_ref, w_ref, a0w_ref, out_ref):
        # Upcast in-kernel; all accumulation in f32.
        diff = pred_ref[...].astype(jnp.float32) - targ_ref[...].astype(jnp.float32)
        if needs_mask:
            i = pl.program_id(0)
            row = jax.lax.broadcasted_iota(jnp.int32, diff.shape, 0)
            diff = jnp.where(i * TB + row < B, diff, 0.0)
        loss = diff * diff                       # elementwise L2

        wsum = jnp.sum(loss * w_ref[...])                   # weighted partial
        a0sum = jnp.sum(loss[:, :A0C] * a0w_ref[...])       # a0 partial (first lanes)

        # One fused (8,256) output block per tile: wsum | a0sum splats.
        out_ref[:, :128] = jnp.full((8, 128), wsum, jnp.float32)
        out_ref[:, 128:] = jnp.full((8, 128), a0sum, jnp.float32)

    parts = pl.pallas_call(
        kernel,
        out_shape=jax.ShapeDtypeStruct((num_tiles * 8, 256), jnp.float32),
        grid=(num_tiles,),
        in_specs=[
            pl.BlockSpec((TB, L), lambda i: (i, 0)),   # pred tile (native dtype)
            pl.BlockSpec((TB, L), lambda i: (i, 0)),   # targ tile (native dtype)
            pl.BlockSpec((1, L), lambda i: (0, 0)),    # weights (broadcast)
            pl.BlockSpec((1, A0C), lambda i: (0, 0)),  # a0 masked reciprocal
        ],
        out_specs=pl.BlockSpec((8, 256), lambda i: (i, 0)),
        compiler_params=pltpu.CompilerParams(
            dimension_semantics=("parallel",),         # disjoint outputs -> megacore OK
            vmem_limit_bytes=vmem_limit,
        ),
    )(pred2, targ2, w_flat, a0w)

    # Each (8,128) half-block is a constant splat -> dense sum / 1024 (exact scale).
    wsum = jnp.sum(parts[:, :128]) * (1.0 / 1024.0)
    a0sum = jnp.sum(parts[:, 128:]) * (1.0 / 1024.0)
    weighted = wsum * jnp.float32(online_weight) / jnp.float32(B * H * T)
    a0_loss = a0sum / jnp.float32(B * action_dim)
    return weighted, {"a0_loss": a0_loss}


def _reference(pred, targ, weights, action_dim, online_weight=1.0):
    pred = pred.astype(jnp.float32)
    targ = targ.astype(jnp.float32)
    loss = (pred - targ) ** 2
    weighted = (loss * weights * online_weight).mean()
    a0 = (loss[:, 0, :action_dim] / weights[0, :action_dim]).mean()
    return weighted, a0


if __name__ == "__main__":
    B, H, T = 2, 8, 32
    action_dim = 8

    key = jax.random.PRNGKey(0)
    k1, k2 = jax.random.split(key)
    pred = jax.random.normal(k1, (B, H, T), dtype=jnp.float32)
    targ = jax.random.normal(k2, (B, H, T), dtype=jnp.float32)

    # Deterministic weights buffer (diffuser-style discounted loss weights).
    discounts = 0.99 ** jnp.arange(H, dtype=jnp.float32)                 # (H,)
    dim_w = jnp.concatenate(
        [jnp.full((action_dim,), 10.0, dtype=jnp.float32),
         jnp.ones((T - action_dim,), dtype=jnp.float32)])                # (T,)
    weights = discounts[:, None] * dim_w[None, :]                        # (H, T)

    # Check 1: tiny batch (single full-dim block, no masking).
    wloss, extras = weighted_loss(pred, targ, weights, action_dim,
                                  online_weight=1.0)
    jax.block_until_ready((wloss, extras["a0_loss"]))
    ref_w, ref_a0 = _reference(pred, targ, weights, action_dim, 1.0)
    assert jnp.allclose(wloss, ref_w, rtol=1e-4, atol=1e-5)
    assert jnp.allclose(extras["a0_loss"], ref_a0, rtol=1e-4, atol=1e-5)

    # Check 2: ragged batch (in-kernel tail masking, >=2 grid steps) and a
    # non-default online_weight (applied outside the kernel).
    B2 = 37
    k3, k4 = jax.random.split(k2)
    pred_b = jax.random.normal(k3, (B2, H, T), dtype=jnp.float32)
    targ_b = jax.random.normal(k4, (B2, H, T), dtype=jnp.float32)
    wloss2, extras2 = weighted_loss(pred_b, targ_b, weights, action_dim,
                                    online_weight=2.5)
    jax.block_until_ready((wloss2, extras2["a0_loss"]))
    ref_w2, ref_a02 = _reference(pred_b, targ_b, weights, action_dim, 2.5)
    assert jnp.allclose(wloss2, ref_w2, rtol=1e-4, atol=1e-5)
    assert jnp.allclose(extras2["a0_loss"], ref_a02, rtol=1e-4, atol=1e-5)

    # Check 3: bf16 inputs streamed in native dtype, upcast inside the kernel.
    pred_bf = pred_b.astype(jnp.bfloat16)
    targ_bf = targ_b.astype(jnp.bfloat16)
    wloss3, extras3 = weighted_loss(pred_bf, targ_bf, weights, action_dim,
                                    online_weight=1.0)
    jax.block_until_ready((wloss3, extras3["a0_loss"]))
    ref_w3, ref_a03 = _reference(pred_bf, targ_bf, weights, action_dim, 1.0)
    assert jnp.allclose(wloss3, ref_w3, rtol=1e-4, atol=1e-5)
    assert jnp.allclose(extras3["a0_loss"], ref_a03, rtol=1e-4, atol=1e-5)

    print("KERNEL_OK")
</pallas_src>

<mosaic_0001>
module attributes {stable_mosaic.version = 11 : i64} {
  func.func @kernel(%arg0: i32, %arg1: memref<2x256xf32, #tpu.memory_space<vmem>>, %arg2: memref<2x256xf32, #tpu.memory_space<vmem>>, %arg3: memref<1x256xf32, #tpu.memory_space<vmem>>, %arg4: memref<1x128xf32, #tpu.memory_space<vmem>>, %arg5: memref<8x256xf32, #tpu.memory_space<vmem>>) attributes {dimension_semantics = [#tpu.dimension_semantics<parallel>], iteration_bounds = array<i64: 1>, scalar_prefetch = 0 : i64, scratch_operands = 0 : i64, tpu.core_type = #tpu.core_type<tc>, window_params = [{transform_indices = @transform_0, window_bounds = array<i64: 2, 256>}, {transform_indices = @transform_1, window_bounds = array<i64: 2, 256>}, {pipeline_mode = #tpu.pipeline_mode<synchronous>, transform_indices = @transform_2, window_bounds = array<i64: 1, 256>}, {pipeline_mode = #tpu.pipeline_mode<synchronous>, transform_indices = @transform_3, window_bounds = array<i64: 1, 128>}, {transform_indices = @transform_4, window_bounds = array<i64: 8, 256>}]} {
    %c0 = arith.constant 0 : index
    %c0_0 = arith.constant 0 : index
    %0 = vector.load %arg1[%c0, %c0_0] : memref<2x256xf32, #tpu.memory_space<vmem>>, vector<2x256xf32>
    %c0_1 = arith.constant 0 : index
    %c0_2 = arith.constant 0 : index
    %1 = vector.load %arg2[%c0_1, %c0_2] : memref<2x256xf32, #tpu.memory_space<vmem>>, vector<2x256xf32>
    %2 = arith.subf %0, %1 : vector<2x256xf32>
    %3 = arith.mulf %2, %2 : vector<2x256xf32>
    %c0_3 = arith.constant 0 : index
    %c0_4 = arith.constant 0 : index
    %4 = vector.load %arg3[%c0_3, %c0_4] : memref<1x256xf32, #tpu.memory_space<vmem>>, vector<1x256xf32>
    %5 = vector.broadcast %4 : vector<1x256xf32> to vector<2x256xf32>
    %6 = arith.mulf %3, %5 : vector<2x256xf32>
    %7 = vector.shape_cast %6 : vector<2x256xf32> to vector<1x2x256xf32>
    %cst = arith.constant dense<0.000000e+00> : vector<1xf32>
    %8 = vector.multi_reduction <add>, %7, %cst [1, 2] : vector<1x2x256xf32> to vector<1xf32>
    %9 = vector.shape_cast %8 : vector<1xf32> to vector<1x1x1xf32>
    %10 = vector.extract %9[0, 0, 0] : f32 from vector<1x1x1xf32>
    %11 = vector.extract_strided_slice %3 {offsets = [0, 0], sizes = [2, 128], strides = [1, 1]} : vector<2x256xf32> to vector<2x128xf32>
    %c0_5 = arith.constant 0 : index
    %c0_6 = arith.constant 0 : index
    %12 = vector.load %arg4[%c0_5, %c0_6] : memref<1x128xf32, #tpu.memory_space<vmem>>, vector<1x128xf32>
    %13 = vector.broadcast %12 : vector<1x128xf32> to vector<2x128xf32>
    %14 = arith.mulf %11, %13 : vector<2x128xf32>
    %15 = vector.shape_cast %14 : vector<2x128xf32> to vector<1x2x128xf32>
    %cst_7 = arith.constant dense<0.000000e+00> : vector<1xf32>
    %16 = vector.multi_reduction <add>, %15, %cst_7 [1, 2] : vector<1x2x128xf32> to vector<1xf32>
    %17 = vector.shape_cast %16 : vector<1xf32> to vector<1x1x1xf32>
    %18 = vector.extract %17[0, 0, 0] : f32 from vector<1x1x1xf32>
    %19 = vector.broadcast %10 : f32 to vector<8x128xf32>
    %c0_8 = arith.constant 0 : index
    %c0_9 = arith.constant 0 : index
    %20 = vector.load %arg5[%c0_8, %c0_9] : memref<8x256xf32, #tpu.memory_space<vmem>>, vector<8x128xf32>
    tpu.vector_store %arg5[%c0_8, %c0_9], %19 {strides = array<i32>} : memref<8x256xf32, #tpu.memory_space<vmem>>, vector<8x128xf32>,
    %21 = vector.broadcast %18 : f32 to vector<8x128xf32>
    %c0_10 = arith.constant 0 : index
    %c128 = arith.constant 128 : index
    %22 = vector.load %arg5[%c0_10, %c128] : memref<8x256xf32, #tpu.memory_space<vmem>>, vector<8x128xf32>
    tpu.vector_store %arg5[%c0_10, %c128], %21 {strides = array<i32>} : memref<8x256xf32, #tpu.memory_space<vmem>>, vector<8x128xf32>,
    return
  }
  func.func @transform_0(%arg0: i32) -> (i32, i32) {
    %c0_i32 = arith.constant 0 : i32
    %c0_i32_0 = arith.constant 0 : i32
    return %arg0, %c0_i32 : i32, i32
  }
  func.func @transform_1(%arg0: i32) -> (i32, i32) {
    %c0_i32 = arith.constant 0 : i32
    %c0_i32_0 = arith.constant 0 : i32
    return %arg0, %c0_i32 : i32, i32
  }
  func.func @transform_2(%arg0: i32) -> (i32, i32) {
    %c0_i32 = arith.constant 0 : i32
    %c0_i32_0 = arith.constant 0 : i32
    %c0_i32_1 = arith.constant 0 : i32
    return %c0_i32, %c0_i32_0 : i32, i32
  }
  func.func @transform_3(%arg0: i32) -> (i32, i32) {
    %c0_i32 = arith.constant 0 : i32
    %c0_i32_0 = arith.constant 0 : i32
    %c0_i32_1 = arith.constant 0 : i32
    return %c0_i32, %c0_i32_0 : i32, i32
  }
  func.func @transform_4(%arg0: i32) -> (i32, i32) {
    %c0_i32 = arith.constant 0 : i32
    %c0_i32_0 = arith.constant 0 : i32
    return %arg0, %c0_i32 : i32, i32
  }
}

</mosaic_0001>

<bundles_post_ra>
// kernel: tpu_custom_call.1
= control target key start
LH: loop header
LB: loop body
LE: loop exit
PB: predicated region body
PF: predicated region fallthrough
CT: control target
= control target key end

     0   :  { %9 = vsyncpa [#allocation3], 0  ;;  %s280_s0 = inlined_call_operand.hbm [shape: f32[2,256], index: 0, kind: input, shape index: {}]   ;;  %s281_s1 = inlined_call_operand.hbm [shape: f32[2,256], index: 1, kind: input, shape index: {}]   ;;  %s282_s2 = inlined_call_operand.vmem [shape: f32[1,256], index: 2, kind: input, shape index: {}]   ;;  %s283_s3 = inlined_call_operand.vmem [shape: f32[1,128], index: 3, kind: input, shape index: {}]   ;;  %s284_s4 = inlined_call_operand.hbm [shape: f32[8,256], index: 4, kind: output, shape index: {}]  }
   0x1   :  { %10 = vsyncpa [#allocation6], 0 }
   0x2   :  { %11 = vsyncpa [#allocation4], 0  ;;  %s209_s15 = smov [#allocation2]   ;;  %s210_s17 = smov [#allocation5]  }
   0x3   :  { %s18_s16 = sshll.u32 %s209_s15, 4  ;;  %s28_s18 = sshll.u32 %s210_s17, 4  ;;  %s19_s16 = int_to_ptr.vmem [resolvable:$true] %s18_s16  ;;  %s29_s18 = int_to_ptr.vmem [resolvable:$true] %s28_s18 }
   0x4   :  { %s137_s21 = scalar_lea.hbm %s280_s0, 64 }
   0x5   :  { %p138_p0 = scmp.ne.s32.totalorder %s280_s0, %s137_s21  ;;  %p141_p1 = scmp.lt.u32.totalorder %s137_s21, %s280_s0 }
   0x7   :  { %p143_p2 = pnand %p141_p1, %p138_p0 }
   0x9   :  { %146 = shalt.err (!%p143_p2)
}
   0xa   :  { %s147_s26 = scalar_lea.vmem %s19_s16, 64  ;;  %p152_p4 = scmp.lt.s32.totalorder %s19_s16, %s19_s16 }
   0xb   :  { %p148_p3 = scmp.ne.s32.totalorder %s19_s16, %s147_s26  ;;  %p153_p5 = scmp.lt.s32.totalorder %s147_s26, %s147_s26 }
   0xd   :  { %p154_p6 = por %p153_p5, %p152_p4 }
   0xf   :  { %p155_p7 = pnand %p154_p6, %p148_p3 }
  0x11   :  { %158 = shalt.err (!%p155_p7)
}
  0x12   :  { %21 = dma.hbm_to_vmem [thread:$0]  %s280_s0, 64, %s19_s16, [#allocation3]  }
  0x13   :  { %s159_s5 = scalar_lea.hbm %s281_s1, 64 }
  0x14   :  { %p160_p8 = scmp.ne.s32.totalorder %s281_s1, %s159_s5  ;;  %p163_p9 = scmp.lt.u32.totalorder %s159_s5, %s281_s1 }
  0x16   :  { %p165_p10 = pnand %p163_p9, %p160_p8 }
  0x18   :  { %168 = shalt.err (!%p165_p10)
}
  0x19   :  { %s169_s10 = scalar_lea.vmem %s29_s18, 64  ;;  %p174_p12 = scmp.lt.s32.totalorder %s29_s18, %s29_s18 }
  0x1a   :  { %p170_p11 = scmp.ne.s32.totalorder %s29_s18, %s169_s10  ;;  %p175_p13 = scmp.lt.s32.totalorder %s169_s10, %s169_s10 }
  0x1c   :  { %p176_p0 = por %p175_p13, %p174_p12 }
  0x1e   :  { %p177_p1 = pnand %p176_p0, %p170_p11 }
  0x20   :  { %180 = shalt.err (!%p177_p1)
}
  0x21   :  { %31 = dma.hbm_to_vmem [thread:$0]  %s281_s1, 64, %s29_s18, [#allocation6]  }
  0x22   :  { %203 = dma.done.wait [#allocation3], 64  }
  0x23   :  { %204 = vsyncadd [#allocation3], 4294967232 }
  0x24   :  { %205 = dma.done.wait [#allocation6], 64  }
  0x25   :  { %206 = vsyncadd [#allocation6], 4294967232  ;;  %v48_v0 = vlaneseq  ;;  %v211_v1 = vmov 1983009808   ;;  %v42_v7 = vld [vmem:[#allocation2] sm:$0xf] }
  0x26   :  { %v58_v2 = vunpack.c.l.s4 %v211_v1  ;;  %v43_v8 = vld [vmem:[#allocation5] sm:$0xf]  ;;  %v46_v9 = vld [vmem:[%s282_s2] sm:$0x3]  ;;  %vm77_vm0 = vcmask 1041408  }
  0x27   :  { %v49_v3 = vshrl.u32 %v48_v0, 7  ;;  %v44_v10 = vsub.f32 %v42_v7, %v43_v8  ;;  %v128_v19 = vld [vmem:[%s283_s3] ss:$0 sm:$0xff]  ;;  %s212_s3 = smov [#allocation7]  }
  0x28   :  { %v59_v6 = vunpack.c.0.s8 %v58_v2  ;;  %s118_s15 = sshll.u32 %s212_s3, 4  ;;  %s119_s15 = int_to_ptr.vmem [resolvable:$true] %s118_s15 }
  0x29   :  { %v50_v4 = vsub.s32 0, %v49_v3  ;;  %v54_v5 = vsub.s32 1, %v49_v3  ;;  %v45_v14 = vmul.f32 %v44_v10, %v44_v10  ;;  %s181_s17 = scalar_lea.vmem %s119_s15, 256  ;;  %p186_p3 = scmp.lt.s32.totalorder %s119_s15, %s119_s15 }
  0x2a   :  { %v62_v13 = vsub.s32 %v59_v6, %v49_v3  ;;  %p182_p2 = scmp.ne.s32.totalorder %s119_s15, %s181_s17  ;;  %p187_p4 = scmp.lt.s32.totalorder %s181_s17, %s181_s17 }
  0x2b   :  { %v51_v11 = vrot.slane %v46_v9, %v50_v4  ;;  %v55_v12 = vrot.slane %v46_v9, %v54_v5  ;;  %v97_v23 = vmul.f32 %v128_v19, %v45_v14 }
  0x2c   :  { %p188_p5 = por %p187_p4, %p186_p3 }
  0x2d   :  { %v56_v15 = vcombine.low %v51_v11, %v55_v12  ;;  %v98_v25 = vsel %vm77_vm0, %v97_v23, 0.0 }
  0x2e   :  { %p189_p6 = pnand %p188_p5, %p182_p2 }
  0x2f   :  { %v63_v16 = vrot.slane %v56_v15, %v62_v13 }
  0x31   :  { %v65_v17 = vmul.f32 %v63_v16, %v45_v14 }
  0x33   :  { %v73_v18 = vrot.slane %v65_v17, %v62_v13 }
  0x35   :  { %v74_v20 = vcombine.high %v73_v18, %v73_v18  ;;  %v78_v21 = vsel %vm77_vm0, %v73_v18, 0.0 }
  0x37   :  { %v79_v22 = vsel %vm77_vm0, %v74_v20, 0.0 }
  0x38   :  { %v80_v24 = vadd.f32 %v79_v22, %v78_v21 }
  0x3a   :  { %81 = vadd.xlane.f32.xlu0 %v80_v24 }
  0x3e   :  { %99 = vadd.xlane.f32.xlu0 %v98_v25 }
  0xc7   :  { %v82_v26 = vpop.xlane.xlu0 %81 }
  0xc8   :  { %v83_v27 = vrot.slane %v82_v26, 4 }
  0xca   :  { %v84_v28 = vadd.f32 %v83_v27, %v82_v26 }
  0xcb   :  { %v100_v29 = vpop.xlane.xlu0 %99 }
  0xcc   :  { %v85_v30 = vrot.slane %v84_v28, 2  ;;  %v101_v31 = vrot.slane %v100_v29, 4 }
  0xce   :  { %v102_v32 = vadd.f32 %v101_v31, %v100_v29  ;;  %v86_v33 = vadd.f32 %v85_v30, %v84_v28 }
  0xd0   :  { %v103_v34 = vrot.slane %v102_v32, 2  ;;  %v87_v35 = vrot.slane %v86_v33, 1 }
  0xd2   :  { %v104_v36 = vadd.f32 %v103_v34, %v102_v32  ;;  %v88_v37 = vadd.f32 %v87_v35, %v86_v33 }
  0xd4   :  { %129 = vpush %v88_v37  ;;  %v105_v38 = vrot.slane %v104_v36, 1 }
  0xd6   :  { %v106_v39 = vadd.f32 %v105_v38, %v104_v36 }
  0xd8   :  { %131 = vpush %v106_v39 }
 0x105   :  { %s130_s2 = spop %129 }
 0x106   :  { %v108_v40 = vstv %s130_s2 }
 0x107   :  { %109 = vst [vmem:[#allocation7] sm:$0xff] %v108_v40 }
 0x109   :  { %s132_s16 = spop %131 }
 0x10a   :  { %v110_v41 = vstv %s132_s16 }
 0x10b   :  { %111 = vst [vmem:[#allocation7 + $0x8] sm:$0xff] %v110_v41 }
 0x10c   :  { %192 = shalt.err (!%p189_p6)
}
 0x10d   :  { %s193_s20 = scalar_lea.hbm %s284_s4, 256 }
 0x10e   :  { %p194_p7 = scmp.ne.s32.totalorder %s284_s4, %s193_s20  ;;  %p197_p8 = scmp.lt.u32.totalorder %s193_s20, %s284_s4 }
 0x110   :  { %p199_p9 = pnand %p197_p8, %p194_p7 }
 0x112   :  { %202 = shalt.err (!%p199_p9)
}
 0x113   :  { %121 = dma.vmem_to_hbm [thread:$0]  %s119_s15, 256, %s284_s4, [#allocation4]  }
 0x114   :  { %207 = dma.done.wait [#allocation4], 256  }
 0x115   :  { %208 = vsyncadd [#allocation4], 4294967040 }
 0x116   :  { %125 = vsyncpa [#allocation3], 1 }
 0x117   :  { %126 = vsyncpa [#allocation6], 1 }
 0x118   :  { %127 = vsyncpa [#allocation4], 1 }

</bundles_post_ra>
